<compile_context>
chip_gen: v6e
topology: v6e:2x2x1
jax: 0.10.0
libtpu: 0.0.40
codegen_flags: <defaults>
</compile_context>

<pallas_src>
import math

import jax
import jax.numpy as jnp
from jax.experimental import pallas as pl
from jax.experimental.pallas import tpu as pltpu


_INV_SQRT2 = 1.0 / math.sqrt(2.0)


def _round_up(x, m):
    return (x + m - 1) // m * m


def _pad_2d(a, rows, cols):
    """Zero-pad a 2-D array up to (rows, cols); no copy if already that shape."""
    r, c = a.shape
    if r == rows and c == cols:
        return a
    return jnp.zeros((rows, cols), a.dtype).at[:r, :c].set(a)


def _ffn_kernel(x_ref, w1_ref, b1_ref, w2_ref, b2_ref, o_ref, acc_ref):
    # x_ref: (tm, Dp), w1_ref: (Dp, th), b1_ref: (1, th),
    # w2_ref: (th, Dp), b2_ref: (1, Dp), o_ref: (tm, Dp), acc_ref: (tm, Dp) f32
    k = pl.program_id(1)
    nk = pl.num_programs(1)

    # First linear for this H-chunk (MXU), f32 accumulate, plus bias slice.
    h = jnp.dot(x_ref[...], w1_ref[...], preferred_element_type=jnp.float32)
    h = h + b1_ref[...].astype(jnp.float32)

    # Exact (erf-based) GELU in f32, matching torch.nn.GELU() default.
    h = 0.5 * h * (1.0 + jax.lax.erf(h * _INV_SQRT2))

    # Dropout(p=0.0) is identity -> skipped.

    # Second linear chunk (MXU); accumulate across H-chunks in f32 scratch.
    contrib = jnp.dot(h.astype(w2_ref.dtype), w2_ref[...],
                      preferred_element_type=jnp.float32)

    @pl.when(k == 0)
    def _():
        acc_ref[...] = contrib      # init with first chunk (skip zero-fill)

    @pl.when(k > 0)
    def _():
        acc_ref[...] += contrib

    @pl.when(k == nk - 1)
    def _():
        o_ref[...] = (acc_ref[...]
                      + b2_ref[...].astype(jnp.float32)).astype(o_ref.dtype)


def feed_forward(x, w1, b1, w2, b2, *, tm=256, th=512):
    """x: (B, S, D). w1: (D, H), b1: (H,), w2: (H, D), b2: (D,)."""
    B, S, D = x.shape
    H = w1.shape[1]
    M = B * S
    dtype = x.dtype

    # Tile sizes: sublane-aligned rows, lane-dense (128-multiple) hidden chunk.
    tm = _round_up(min(tm, _round_up(M, 8)), 8)
    th = _round_up(min(th, _round_up(H, 128)), 128)

    # Padded, lane-dense shapes. Zero padding is exact: padded hidden columns
    # get h = bias-free 0 -> GELU(0) = 0 -> zero contribution; padded D columns
    # multiply zero weight rows; padded output columns are sliced off below.
    Dp = _round_up(D, 128)
    Hp = _round_up(H, th)
    Mp = _round_up(M, tm)

    x2 = _pad_2d(x.reshape(M, D), Mp, Dp)
    w1p = _pad_2d(w1, Dp, Hp)
    b1p = _pad_2d(b1.reshape(1, H), 1, Hp)
    w2p = _pad_2d(w2, Hp, Dp)
    b2p = _pad_2d(b2.reshape(1, D), 1, Dp)

    # VMEM budget: double-buffered input tiles + output tiles + f32 accumulator
    # + f32 hidden chunk, with 1.5x headroom, clamped to fit v7x (64 MiB VMEM).
    ib = jnp.dtype(dtype).itemsize
    est = (2 * (tm * Dp + Dp * th + th + th * Dp + Dp) * ib  # dbl-buffered inputs
           + 2 * tm * Dp * ib                                # output double buffer
           + tm * Dp * 4                                     # f32 accumulator
           + 2 * tm * th * 4)                                # f32 hidden chunk + temps
    vmem_limit = int(min(max(int(1.5 * est), 32 << 20), 60 << 20))

    grid = (Mp // tm, Hp // th)

    out = pl.pallas_call(
        _ffn_kernel,
        out_shape=jax.ShapeDtypeStruct((Mp, Dp), dtype),
        grid_spec=pltpu.PrefetchScalarGridSpec(
            num_scalar_prefetch=0,
            grid=grid,
            in_specs=[
                pl.BlockSpec((tm, Dp), lambda i, k: (i, 0)),   # x row tile
                pl.BlockSpec((Dp, th), lambda i, k: (0, k)),   # W1 H-chunk
                pl.BlockSpec((1, th), lambda i, k: (0, k)),    # b1 H-chunk
                pl.BlockSpec((th, Dp), lambda i, k: (k, 0)),   # W2 H-chunk
                pl.BlockSpec((1, Dp), lambda i, k: (0, 0)),    # b2 (resident)
            ],
            out_specs=pl.BlockSpec((tm, Dp), lambda i, k: (i, 0)),
            scratch_shapes=[pltpu.VMEM((tm, Dp), jnp.float32)],
        ),
        compiler_params=pltpu.CompilerParams(
            dimension_semantics=("parallel", "arbitrary"),
            vmem_limit_bytes=vmem_limit),
    )(x2, w1p, b1p, w2p, b2p)

    return out[:M, :D].reshape(B, S, D)


def _ref_feed_forward(x, w1, b1, w2, b2):
    h = jnp.einsum("bsd,dh->bsh", x, w1) + b1
    h = jax.nn.gelu(h, approximate=False)
    return jnp.einsum("bsh,hd->bsd", h, w2) + b2


if __name__ == "__main__":
    # Small shapes consistent with the module: batch=2, seq=8, dim=32, hidden=64.
    B, S, D, H = 2, 8, 32, 64

    key = jax.random.PRNGKey(0)
    kx, kw1, kb1, kw2, kb2 = jax.random.split(key, 5)

    x = jax.random.normal(kx, (B, S, D), dtype=jnp.float32)

    # Deterministic PyTorch-style init: U(-1/sqrt(fan_in), 1/sqrt(fan_in)).
    lim1 = 1.0 / math.sqrt(D)
    lim2 = 1.0 / math.sqrt(H)
    w1 = jax.random.uniform(kw1, (D, H), jnp.float32, -lim1, lim1)
    b1 = jax.random.uniform(kb1, (H,), jnp.float32, -lim1, lim1)
    w2 = jax.random.uniform(kw2, (H, D), jnp.float32, -lim2, lim2)
    b2 = jax.random.uniform(kb2, (D,), jnp.float32, -lim2, lim2)

    out = feed_forward(x, w1, b1, w2, b2)
    out = jax.block_until_ready(out)

    ref = _ref_feed_forward(x, w1, b1, w2, b2)
    if not jnp.allclose(out, ref, atol=1e-5, rtol=1e-5):
        raise AssertionError("Pallas FeedForward does not match reference")

    print("KERNEL_OK")
</pallas_src>

<mosaic_0001>
module attributes {stable_mosaic.version = 11 : i64} {
  func.func @_ffn_kernel(%arg0: i32, %arg1: i32, %arg2: memref<16x128xf32, #tpu.memory_space<vmem>>, %arg3: memref<128x128xf32, #tpu.memory_space<vmem>>, %arg4: memref<1x128xf32, #tpu.memory_space<vmem>>, %arg5: memref<128x128xf32, #tpu.memory_space<vmem>>, %arg6: memref<1x128xf32, #tpu.memory_space<vmem>>, %arg7: memref<16x128xf32, #tpu.memory_space<vmem>>, %arg8: memref<16x128xf32, #tpu.memory_space<vmem>>) attributes {dimension_semantics = [#tpu.dimension_semantics<parallel>, #tpu.dimension_semantics<arbitrary>], iteration_bounds = array<i64: 1, 1>, scalar_prefetch = 0 : i64, scratch_operands = 1 : i64, tpu.core_type = #tpu.core_type<tc>, window_params = [{transform_indices = @transform_0, window_bounds = array<i64: 16, 128>}, {transform_indices = @transform_1, window_bounds = array<i64: 128, 128>}, {transform_indices = @transform_2, window_bounds = array<i64: 1, 128>}, {transform_indices = @transform_3, window_bounds = array<i64: 128, 128>}, {pipeline_mode = #tpu.pipeline_mode<synchronous>, transform_indices = @transform_4, window_bounds = array<i64: 1, 128>}, {transform_indices = @transform_5, window_bounds = array<i64: 16, 128>}]} {
    %c0 = arith.constant 0 : index
    %c0_0 = arith.constant 0 : index
    %0 = vector.load %arg2[%c0, %c0_0] : memref<16x128xf32, #tpu.memory_space<vmem>>, vector<16x128xf32>
    %c0_1 = arith.constant 0 : index
    %c0_2 = arith.constant 0 : index
    %1 = vector.load %arg3[%c0_1, %c0_2] : memref<128x128xf32, #tpu.memory_space<vmem>>, vector<128x128xf32>
    %cst = arith.constant dense<0.000000e+00> : vector<16x128xf32>
    %2 = tpu.matmul %0, %1, %cst {dimension_numbers = #tpu.dot_dimension_numbers<[1], [0], [0], [1], [0, 0, 1, 1], [], []>} : vector<16x128xf32>, vector<128x128xf32>, vector<16x128xf32> -> vector<16x128xf32>
    %c0_3 = arith.constant 0 : index
    %c0_4 = arith.constant 0 : index
    %3 = vector.load %arg4[%c0_3, %c0_4] : memref<1x128xf32, #tpu.memory_space<vmem>>, vector<1x128xf32>
    %4 = vector.broadcast %3 : vector<1x128xf32> to vector<16x128xf32>
    %5 = arith.addf %2, %4 : vector<16x128xf32>
    %cst_5 = arith.constant 5.000000e-01 : f32
    %6 = vector.broadcast %cst_5 : f32 to vector<16x128xf32>
    %7 = arith.mulf %6, %5 : vector<16x128xf32>
    %cst_6 = arith.constant 0.707106769 : f32
    %8 = vector.broadcast %cst_6 : f32 to vector<16x128xf32>
    %9 = arith.mulf %5, %8 : vector<16x128xf32>
    %10 = math.erf %9 : vector<16x128xf32>
    %cst_7 = arith.constant 1.000000e+00 : f32
    %11 = vector.broadcast %cst_7 : f32 to vector<16x128xf32>
    %12 = arith.addf %11, %10 : vector<16x128xf32>
    %13 = arith.mulf %7, %12 : vector<16x128xf32>
    %c0_8 = arith.constant 0 : index
    %c0_9 = arith.constant 0 : index
    %14 = vector.load %arg5[%c0_8, %c0_9] : memref<128x128xf32, #tpu.memory_space<vmem>>, vector<128x128xf32>
    %cst_10 = arith.constant dense<0.000000e+00> : vector<16x128xf32>
    %15 = tpu.matmul %13, %14, %cst_10 {dimension_numbers = #tpu.dot_dimension_numbers<[1], [0], [0], [1], [0, 0, 1, 1], [], []>} : vector<16x128xf32>, vector<128x128xf32>, vector<16x128xf32> -> vector<16x128xf32>
    %c0_i32 = arith.constant 0 : i32
    %16 = arith.cmpi eq, %arg1, %c0_i32 : i32
    %17 = arith.extui %16 : i1 to i32
    %c0_i32_11 = arith.constant 0 : i32
    %18 = arith.cmpi ne, %17, %c0_i32_11 : i32
    scf.if %18 {
      %c0_16 = arith.constant 0 : index
      %c0_17 = arith.constant 0 : index
      %25 = vector.load %arg8[%c0_16, %c0_17] : memref<16x128xf32, #tpu.memory_space<vmem>>, vector<16x128xf32>
      tpu.vector_store %arg8[%c0_16, %c0_17], %15 {strides = array<i32>} : memref<16x128xf32, #tpu.memory_space<vmem>>, vector<16x128xf32>,
    } else {
    }
    %c0_i32_12 = arith.constant 0 : i32
    %19 = arith.cmpi sgt, %arg1, %c0_i32_12 : i32
    %20 = arith.extui %19 : i1 to i32
    %c0_i32_13 = arith.constant 0 : i32
    %21 = arith.cmpi ne, %20, %c0_i32_13 : i32
    scf.if %21 {
      %c0_16 = arith.constant 0 : index
      %c0_17 = arith.constant 0 : index
      %25 = vector.load %arg8[%c0_16, %c0_17] : memref<16x128xf32, #tpu.memory_space<vmem>>, vector<16x128xf32>
      %26 = arith.addf %25, %15 : vector<16x128xf32>
      %c0_18 = arith.constant 0 : index
      %c0_19 = arith.constant 0 : index
      %27 = vector.load %arg8[%c0_18, %c0_19] : memref<16x128xf32, #tpu.memory_space<vmem>>, vector<16x128xf32>
      tpu.vector_store %arg8[%c0_18, %c0_19], %26 {strides = array<i32>} : memref<16x128xf32, #tpu.memory_space<vmem>>, vector<16x128xf32>,
    } else {
    }
    %c0_i32_14 = arith.constant 0 : i32
    %22 = arith.cmpi eq, %arg1, %c0_i32_14 : i32
    %23 = arith.extui %22 : i1 to i32
    %c0_i32_15 = arith.constant 0 : i32
    %24 = arith.cmpi ne, %23, %c0_i32_15 : i32
    scf.if %24 {
      %c0_16 = arith.constant 0 : index
      %c0_17 = arith.constant 0 : index
      %25 = vector.load %arg8[%c0_16, %c0_17] : memref<16x128xf32, #tpu.memory_space<vmem>>, vector<16x128xf32>
      %c0_18 = arith.constant 0 : index
      %c0_19 = arith.constant 0 : index
      %26 = vector.load %arg6[%c0_18, %c0_19] : memref<1x128xf32, #tpu.memory_space<vmem>>, vector<1x128xf32>
      %27 = vector.broadcast %26 : vector<1x128xf32> to vector<16x128xf32>
      %28 = arith.addf %25, %27 : vector<16x128xf32>
      %c0_20 = arith.constant 0 : index
      %c0_21 = arith.constant 0 : index
      %29 = vector.load %arg7[%c0_20, %c0_21] : memref<16x128xf32, #tpu.memory_space<vmem>>, vector<16x128xf32>
      tpu.vector_store %arg7[%c0_20, %c0_21], %28 {strides = array<i32>} : memref<16x128xf32, #tpu.memory_space<vmem>>, vector<16x128xf32>,
    } else {
    }
    return
  }
  func.func @transform_0(%arg0: i32, %arg1: i32) -> (i32, i32) {
    %c0_i32 = arith.constant 0 : i32
    %c0_i32_0 = arith.constant 0 : i32
    return %arg0, %c0_i32 : i32, i32
  }
  func.func @transform_1(%arg0: i32, %arg1: i32) -> (i32, i32) {
    %c0_i32 = arith.constant 0 : i32
    %c0_i32_0 = arith.constant 0 : i32
    return %c0_i32, %arg1 : i32, i32
  }
  func.func @transform_2(%arg0: i32, %arg1: i32) -> (i32, i32) {
    %c0_i32 = arith.constant 0 : i32
    %c0_i32_0 = arith.constant 0 : i32
    return %c0_i32, %arg1 : i32, i32
  }
  func.func @transform_3(%arg0: i32, %arg1: i32) -> (i32, i32) {
    %c0_i32 = arith.constant 0 : i32
    %c0_i32_0 = arith.constant 0 : i32
    return %arg1, %c0_i32 : i32, i32
  }
  func.func @transform_4(%arg0: i32, %arg1: i32) -> (i32, i32) {
    %c0_i32 = arith.constant 0 : i32
    %c0_i32_0 = arith.constant 0 : i32
    %c0_i32_1 = arith.constant 0 : i32
    return %c0_i32, %c0_i32_0 : i32, i32
  }
  func.func @transform_5(%arg0: i32, %arg1: i32) -> (i32, i32) {
    %c0_i32 = arith.constant 0 : i32
    %c0_i32_0 = arith.constant 0 : i32
    return %arg0, %c0_i32 : i32, i32
  }
}

</mosaic_0001>

<bundles_post_ra>
// kernel: tpu_custom_call.1
= control target key start
LH: loop header
LB: loop body
LE: loop exit
PB: predicated region body
PF: predicated region fallthrough
CT: control target
= control target key end

     0   :  { %10 = vsyncpa [#allocation4], 0  ;;  %s583_s0 = inlined_call_operand.hbm [shape: f32[16,128], index: 0, kind: input, shape index: {}]   ;;  %s584_s1 = inlined_call_operand.hbm [shape: f32[128,128], index: 1, kind: input, shape index: {}]   ;;  %s585_s2 = inlined_call_operand.vmem [shape: f32[1,128], index: 2, kind: input, shape index: {}]   ;;  %s586_s3 = inlined_call_operand.hbm [shape: f32[128,128], index: 3, kind: input, shape index: {}]   ;;  %s587_s4 = inlined_call_operand.vmem [shape: f32[1,128], index: 4, kind: input, shape index: {}]   ;;  %s588_s5 = inlined_call_operand.hbm [shape: f32[16,128], index: 5, kind: output, shape index: {}]  }
   0x1   :  { %11 = vsyncpa [#allocation7], 0 }
   0x2   :  { %12 = vsyncpa [#allocation5], 0  ;;  %s517_s18 = smov [#allocation6]   ;;  %s518_s20 = smov [#allocation3]  }
   0x3   :  { %s30_s19 = sshll.u32 %s517_s18, 4  ;;  %s18_s21 = sshll.u32 %s518_s20, 4  ;;  %s31_s19 = int_to_ptr.vmem [resolvable:$true] %s30_s19  ;;  %s19_s21 = int_to_ptr.vmem [resolvable:$true] %s18_s21 }
   0x4   :  { %s439_s22 = scalar_lea.vmem %s31_s19, 2048  ;;  %p444_p1 = scmp.lt.s32.totalorder %s31_s19, %s31_s19 }
   0x5   :  { %p440_p0 = scmp.ne.s32.totalorder %s31_s19, %s439_s22  ;;  %p445_p2 = scmp.lt.s32.totalorder %s439_s22, %s439_s22 }
   0x7   :  { %p446_p3 = por %p445_p2, %p444_p1 }
   0x9   :  { %p447_p4 = pnand %p446_p3, %p440_p0 }
   0xb   :  { %450 = shalt.err (!%p447_p4)
}
   0xc   :  { %s519_s23 = smov 128   ;;  %s520_s24 = smov 8  }
   0xd   :  { %36 = dma.hbm_to_vmem [thread:$0]  %s584_s1, 2048, %s31_s19, [#allocation7], %s519_s23, %s519_s23, %s520_s24  }
   0xe   :  { %s459_s27 = scalar_lea.vmem %s19_s21, 256  ;;  %p464_p6 = scmp.lt.s32.totalorder %s19_s21, %s19_s21 }
   0xf   :  { %p460_p5 = scmp.ne.s32.totalorder %s19_s21, %s459_s27  ;;  %p465_p7 = scmp.lt.s32.totalorder %s459_s27, %s459_s27 }
  0x11   :  { %p466_p8 = por %p465_p7, %p464_p6 }
  0x13   :  { %p467_p9 = pnand %p466_p8, %p460_p5 }
  0x15   :  { %470 = shalt.err (!%p467_p9)
}
  0x16   :  { %24 = dma.hbm_to_vmem [thread:$0]  %s583_s0, 256, %s19_s21, [#allocation4], %s519_s23, %s519_s23, %s520_s24  }
  0x17   :  { %s521_s30 = smov [#allocation8]  }
  0x18   :  { %s44_s6 = sshll.u32 %s521_s30, 4  ;;  %s45_s6 = int_to_ptr.vmem [resolvable:$true] %s44_s6 }
  0x19   :  { %s479_s7 = scalar_lea.vmem %s45_s6, 2048  ;;  %p484_p11 = scmp.lt.s32.totalorder %s45_s6, %s45_s6 }
  0x1a   :  { %p480_p10 = scmp.ne.s32.totalorder %s45_s6, %s479_s7  ;;  %p485_p12 = scmp.lt.s32.totalorder %s479_s7, %s479_s7 }
  0x1c   :  { %p486_p13 = por %p485_p12, %p484_p11 }
  0x1e   :  { %p487_p0 = pnand %p486_p13, %p480_p10 }
  0x20   :  { %490 = shalt.err (!%p487_p0)
}
  0x21   :  { %50 = dma.hbm_to_vmem [thread:$0]  %s586_s3, 2048, %s45_s6, [#allocation7], %s519_s23, %s519_s23, %s520_s24  }
  0x22   :  { %511 = dma.done.wait [#allocation4], 256  }
  0x23   :  { %512 = vsyncadd [#allocation4], 4294967040 }
  0x24   :  { %513 = dma.done.wait [#allocation7], 4096  }
  0x25   :  { %514 = vsyncadd [#allocation7], 4294963200  ;;  %v79_v0 = vld [vmem:[#allocation6 + $0x78] sm:$0xff]  ;;  %v78_v1 = vld [vmem:[#allocation6 + $0x70] sm:$0xff]  ;;  %s522_s10 = smov [#allocation9]  }
  0x26   :  { %351 = vmatprep.subr.mxu0 %v79_v0  ;;  %v77_v2 = vld [vmem:[#allocation6 + $0x68] sm:$0xff]  ;;  %v76_v3 = vld [vmem:[#allocation6 + $0x60] sm:$0xff]  ;;  %v62_v4 = vld [vmem:[#allocation3] sm:$0xff]  ;;  %s300_s11 = sshll.u32 %s522_s10, 4  ;;  %s301_s11 = int_to_ptr.vmem [resolvable:$true] %s300_s11 }
  0x27   :  { %352 = vmatpush3.msra.mxu0 %v79_v0  ;;  %v75_v5 = vld [vmem:[#allocation6 + $0x58] sm:$0xff]  ;;  %383 = vmatprep.mubr.f32.mxu0 %v62_v4  ;;  %v186_v7 = vld [vmem:[#allocation8 + $0x70] sm:$0xff]  ;;  %v185_v9 = vld [vmem:[#allocation8 + $0x68] sm:$0xff]  ;;  %s491_s12 = scalar_lea.vmem %s301_s11, 256  ;;  %p496_p2 = scmp.lt.s32.totalorder %s301_s11, %s301_s11 }
  0x28   :  { %353 = vmatprep.subr.mxu0 %v78_v1  ;;  %v187_v6 = vld [vmem:[#allocation8 + $0x78] sm:$0xff]  ;;  %v74_v8 = vld [vmem:[#allocation6 + $0x50] sm:$0xff]  ;;  %v73_v10 = vld [vmem:[#allocation6 + $0x48] sm:$0xff]  ;;  %p492_p1 = scmp.ne.s32.totalorder %s301_s11, %s491_s12  ;;  %p497_p3 = scmp.lt.s32.totalorder %s491_s12, %s491_s12 }
  0x29   :  { %354 = vmatpush3.msra.mxu0 %v78_v1  ;;  %386 = vmatprep.subr.mxu1 %v187_v6  ;;  %v72_v11 = vld [vmem:[#allocation6 + $0x40] sm:$0xff]  ;;  %v71_v12 = vld [vmem:[#allocation6 + $0x38] sm:$0xff]  ;;  %v70_v13 = vld [vmem:[#allocation6 + $0x30] sm:$0xff] }
  0x2a   :  { %355 = vmatprep.subr.mxu0 %v77_v2  ;;  %387 = vmatpush3.msra.mxu1 %v187_v6  ;;  %v69_v14 = vld [vmem:[#allocation6 + $0x28] sm:$0xff]  ;;  %v68_v15 = vld [vmem:[#allocation6 + $0x20] sm:$0xff]  ;;  %v67_v16 = vld [vmem:[#allocation6 + $0x18] sm:$0xff]  ;;  %p498_p4 = por %p497_p3, %p496_p2 }
  0x2b   :  { %356 = vmatpush3.msra.mxu0 %v77_v2  ;;  %388 = vmatprep.subr.mxu1 %v186_v7  ;;  %v66_v17 = vld [vmem:[#allocation6 + $0x10] sm:$0xff]  ;;  %v65_v18 = vld [vmem:[#allocation6 + $0x8] sm:$0xff]  ;;  %v64_v19 = vld [vmem:[#allocation6] sm:$0xff] }
  0x2c   :  { %357 = vmatprep.subr.mxu0 %v76_v3  ;;  %389 = vmatpush3.msra.mxu1 %v186_v7  ;;  %v63_v20 = vld [vmem:[#allocation3 + $0x8] sm:$0xff]  ;;  %v184_v21 = vld [vmem:[#allocation8 + $0x60] sm:$0xff]  ;;  %v182_v23 = vld [vmem:[#allocation8 + $0x50] sm:$0xff]  ;;  %p499_p5 = pnand %p498_p4, %p492_p1 }
  0x2d   :  { %358 = vmatpush3.msra.mxu0 %v76_v3  ;;  %390 = vmatprep.subr.mxu1 %v185_v9  ;;  %v183_v22 = vld [vmem:[#allocation8 + $0x58] sm:$0xff]  ;;  %v181_v24 = vld [vmem:[#allocation8 + $0x48] sm:$0xff]  ;;  %v180_v25 = vld [vmem:[#allocation8 + $0x40] sm:$0xff] }
  0x2e   :  { %359 = vmatprep.subr.mxu0 %v75_v5  ;;  %391 = vmatpush3.msra.mxu1 %v185_v9  ;;  %v179_v26 = vld [vmem:[#allocation8 + $0x38] sm:$0xff]  ;;  %v178_v27 = vld [vmem:[#allocation8 + $0x30] sm:$0xff]  ;;  %v177_v28 = vld [vmem:[#allocation8 + $0x28] sm:$0xff] }
  0x2f   :  { %360 = vmatpush3.msra.mxu0 %v75_v5  ;;  %392 = vmatprep.subr.mxu1 %v184_v21  ;;  %v176_v29 = vld [vmem:[#allocation8 + $0x20] sm:$0xff]  ;;  %v175_v30 = vld [vmem:[#allocation8 + $0x18] sm:$0xff]  ;;  %v174_v31 = vld [vmem:[#allocation8 + $0x10] sm:$0xff] }
  0x30   :  { %361 = vmatprep.subr.mxu0 %v74_v8  ;;  %393 = vmatpush3.msra.mxu1 %v184_v21  ;;  %v173_v32 = vld [vmem:[#allocation8 + $0x8] sm:$0xff]  ;;  %v172_v33 = vld [vmem:[#allocation8] sm:$0xff]  ;;  %v313_v34 = vld [vmem:[%s585_s2] ss:$0 sm:$0xff] }
  0x31   :  { %362 = vmatpush3.msra.mxu0 %v74_v8  ;;  %394 = vmatprep.subr.mxu1 %v183_v22  ;;  %v314_v49 = vld [vmem:[%s587_s4] ss:$0 sm:$0xff] }
  0x32   :  { %363 = vmatprep.subr.mxu0 %v73_v10  ;;  %395 = vmatpush3.msra.mxu1 %v183_v22 }
  0x33   :  { %364 = vmatpush3.msra.mxu0 %v73_v10  ;;  %396 = vmatprep.subr.mxu1 %v182_v23 }
  0x34   :  { %365 = vmatprep.subr.mxu0 %v72_v11  ;;  %397 = vmatpush3.msra.mxu1 %v182_v23 }
  0x35   :  { %366 = vmatpush3.msra.mxu0 %v72_v11  ;;  %398 = vmatprep.subr.mxu1 %v181_v24 }
  0x36   :  { %367 = vmatprep.subr.mxu0 %v71_v12  ;;  %399 = vmatpush3.msra.mxu1 %v181_v24 }
  0x37   :  { %368 = vmatpush3.msra.mxu0 %v71_v12  ;;  %400 = vmatprep.subr.mxu1 %v180_v25 }
  0x38   :  { %369 = vmatprep.subr.mxu0 %v70_v13  ;;  %401 = vmatpush3.msra.mxu1 %v180_v25 }
  0x39   :  { %370 = vmatpush3.msra.mxu0 %v70_v13  ;;  %402 = vmatprep.subr.mxu1 %v179_v26 }
  0x3a   :  { %371 = vmatprep.subr.mxu0 %v69_v14  ;;  %403 = vmatpush3.msra.mxu1 %v179_v26 }
  0x3b   :  { %372 = vmatpush3.msra.mxu0 %v69_v14  ;;  %404 = vmatprep.subr.mxu1 %v178_v27 }
  0x3c   :  { %373 = vmatprep.subr.mxu0 %v68_v15  ;;  %405 = vmatpush3.msra.mxu1 %v178_v27 }
  0x3d   :  { %374 = vmatpush3.msra.mxu0 %v68_v15  ;;  %406 = vmatprep.subr.mxu1 %v177_v28 }
  0x3e   :  { %375 = vmatprep.subr.mxu0 %v67_v16  ;;  %407 = vmatpush3.msra.mxu1 %v177_v28 }
  0x3f   :  { %376 = vmatpush3.msra.mxu0 %v67_v16  ;;  %408 = vmatprep.subr.mxu1 %v176_v29 }
  0x40   :  { %377 = vmatprep.subr.mxu0 %v66_v17  ;;  %409 = vmatpush3.msra.mxu1 %v176_v29 }
  0x41   :  { %378 = vmatpush3.msra.mxu0 %v66_v17  ;;  %410 = vmatprep.subr.mxu1 %v175_v30 }
  0x42   :  { %379 = vmatprep.subr.mxu0 %v65_v18  ;;  %411 = vmatpush3.msra.mxu1 %v175_v30 }
  0x43   :  { %380 = vmatpush3.msra.mxu0 %v65_v18  ;;  %412 = vmatprep.subr.mxu1 %v174_v31 }
  0x44   :  { %381 = vmatprep.subr.mxu0 %v64_v19  ;;  %413 = vmatpush3.msra.mxu1 %v174_v31 }
  0x45   :  { %382 = vmatpush3.msra.mxu0 %v64_v19  ;;  %414 = vmatprep.subr.mxu1 %v173_v32 }
  0x46   :  { %384 = vmatmul.mubr.f32.vlgmr.msra.gmra.mxu0 %v63_v20  ;;  %415 = vmatpush3.msra.mxu1 %v173_v32 }
  0x47   :  { %416 = vmatprep.subr.mxu1 %v172_v33 }
  0x48   :  { %417 = vmatpush3.msra.mxu1 %v172_v33 }
 0x106   :  { %v385_v35 = vpop.f32.mrf.mxu0 }
 0x107   :  { %v159_v36 = vadd.f32 %v385_v35, %v313_v34 }
 0x108   :  { %v153_v37 = vpop.f32.mrf.mxu0 }
 0x109   :  { %v165_v38 = vmul.f32 0.70710677, %v159_v36  ;;  %v154_v39 = vadd.f32 %v313_v34, %v153_v37  ;;  %v163_v46 = vmul.f32 0.5, %v159_v36 }
 0x10b   :  { %427 = verf.f32 %v165_v38  ;;  %v164_v40 = vmul.f32 0.70710677, %v154_v39  ;;  %v162_v44 = vmul.f32 0.5, %v154_v39 }
 0x10d   :  { %429 = verf.f32 %v164_v40 }
 0x118   :  { %v428_v41 = vpop.eup %427 }
 0x119   :  { %v169_v43 = vadd.f32 1.0, %v428_v41 }
 0x11a   :  { %v430_v42 = vpop.eup %429 }
 0x11b   :  { %v168_v45 = vadd.f32 1.0, %v430_v42  ;;  %v171_v48 = vmul.f32 %v169_v43, %v163_v46 }
 0x11d   :  { %v170_v47 = vmul.f32 %v168_v45, %v162_v44 }
 0x11f   :  { %418 = vmatprep.mubr.f32.mxu1 %v170_v47 }
 0x120   :  { %419 = vmatmul.mubr.f32.vlgmr.msra.gmra.mxu1 %v171_v48 }
 0x1e0   :  { %v420_v50 = vpop.f32.mrf.mxu1 }
 0x1e1   :  { %v292_v51 = vadd.f32 %v420_v50, %v314_v49 }
 0x1e2   :  { %v254_v52 = vpop.f32.mrf.mxu1 }
 0x1e3   :  { %294 = vst [vmem:[#allocation9 + $0x8] sm:$0xff] %v292_v51  ;;  %v291_v53 = vadd.f32 %v314_v49, %v254_v52 }
 0x1e5   :  { %293 = vst [vmem:[#allocation9] sm:$0xff] %v291_v53 }
 0x1e6   :  { %502 = shalt.err (!%p499_p5)
}
 0x1e7   :  { %306 = dma.vmem_to_hbm [thread:$0]  %s301_s11, 256, %s588_s5, [#allocation5], %s519_s23, %s519_s23, %s520_s24  }
 0x1e8   :  { %515 = dma.done.wait [#allocation5], 256  }
 0x1e9   :  { %516 = vsyncadd [#allocation5], 4294967040 }
 0x1ea   :  { %310 = vsyncpa [#allocation4], 1 }
 0x1eb   :  { %311 = vsyncpa [#allocation7], 1 }
 0x1ec   :  { %312 = vsyncpa [#allocation5], 1 }

</bundles_post_ra>
